<compile_context>
chip_gen: v6e
topology: v6e:2x2x1
jax: 0.10.0
libtpu: 0.0.40
codegen_flags: <defaults>
</compile_context>

<pallas_src>
import functools

import jax
import jax.numpy as jnp
from jax.experimental import pallas as pl
from jax.experimental.pallas import tpu as pltpu


def _make_fused_mlp_kernel(n_linear):
    """Kernel for `n_linear` stacked Linear layers; tanh after all but the last.

    refs = (x_ref, w0_ref, b0_ref, ..., w{n-1}_ref, b{n-1}_ref, o_ref).
    Intermediates live in vregs only.
    """

    def kernel(*refs):
        x_ref = refs[0]
        o_ref = refs[-1]
        h = x_ref[...]                                    # (B, d_in) f32
        for i in range(n_linear):
            w = refs[1 + 2 * i][...]                      # (K_pad, N_pad) bf16
            b = refs[2 + 2 * i][...]                      # (1, N_pad)     f32
            # bf16 operands -> one native MXU pass; accumulate in f32.
            h = jnp.dot(h.astype(jnp.bfloat16), w,
                        preferred_element_type=jnp.float32) + b
            if i < n_linear - 1:
                h = jnp.tanh(h)                           # hidden activation (EUP, f32)
        o_ref[...] = h.astype(o_ref.dtype)

    return kernel


def fused_mlp(x, prepared_params):
    """Whole MLP in a single pallas_call; all operands fully resident in VMEM."""
    B = x.shape[0]
    n = len(prepared_params)
    n_out_pad = prepared_params[-1][0].shape[1]

    operands = [x]
    in_specs = [pl.BlockSpec(memory_space=pltpu.MemorySpace.VMEM)]
    flops = 0
    transcendentals = 0
    bytes_accessed = x.size * x.dtype.itemsize
    for i, (w, b) in enumerate(prepared_params):
        operands += [w, b]
        in_specs += [pl.BlockSpec(memory_space=pltpu.MemorySpace.VMEM),
                     pl.BlockSpec(memory_space=pltpu.MemorySpace.VMEM)]
        flops += 2 * B * w.shape[0] * w.shape[1] + B * w.shape[1]
        bytes_accessed += w.size * w.dtype.itemsize + b.size * b.dtype.itemsize
        if i < n - 1:
            transcendentals += B * w.shape[1]
    bytes_accessed += B * n_out_pad * 4

    return pl.pallas_call(
        _make_fused_mlp_kernel(n),
        out_shape=jax.ShapeDtypeStruct((B, n_out_pad), jnp.float32),
        in_specs=in_specs,
        out_specs=pl.BlockSpec(memory_space=pltpu.MemorySpace.VMEM),
        cost_estimate=pl.CostEstimate(
            flops=flops,
            transcendentals=transcendentals,
            bytes_accessed=bytes_accessed,
        ),
    )(*operands)


@functools.partial(jax.jit, static_argnames=("d_output",))
def stacked_vector_forward(x, prepared_params, *, d_output):
    """torch.flatten(x, start_dim=1) -> fused MLP -> slice off the 128-lane padding."""
    B = x.shape[0]
    h = jnp.reshape(x, (B, -1)).astype(jnp.float32)
    out_padded = fused_mlp(h, prepared_params)
    return out_padded[:, :d_output]


def init_params(key, n_layers, d_input, hidden_units, d_output):
    """Logical (unpadded, f32) params mirroring nn.Linear init.

    Weights stored (in_features, out_features), i.e. y = x @ W + b with
    W = torch_weight.T; biases pre-shaped (1, out_features).
    """
    dims = []
    in_features = d_input
    for i in range(n_layers):
        out_features = hidden_units[i] if i < len(hidden_units) else hidden_units[-1]
        dims.append((in_features, out_features))
        in_features = out_features
    dims.append((in_features, d_output))

    params = []
    for fin, fout in dims:
        key, kw, kb = jax.random.split(key, 3)
        bound = 1.0 / float(jnp.sqrt(fin))
        w = jax.random.uniform(kw, (fin, fout), jnp.float32, -bound, bound)
        b = jax.random.uniform(kb, (1, fout), jnp.float32, -bound, bound)
        params.append((w, b))
    return params


def prepare_params(params, d_input):
    """ONE-TIME (init-time) padding + casting; removed from the per-forward path.

    - Every layer's output width is zero-padded to a multiple of 128 (lane-dense dots,
      bias adds, and stores); each layer's input width is padded to match the previous
      layer's padded output.  Exact: tanh(0)=0 and zero rows/cols contribute nothing.
    - Layer 0 keeps K = d_input so x never needs a per-forward pad.
    - Weights cast to bf16 (native MXU operand); biases stay f32.
    """
    prepared = []
    k_in = d_input
    for (w, b) in params:
        f_in, f_out = w.shape
        f_out_pad = pl.cdiv(f_out, 128) * 128
        w_p = jnp.zeros((k_in, f_out_pad), jnp.float32).at[:f_in, :f_out].set(w)
        b_p = jnp.zeros((1, f_out_pad), jnp.float32).at[:, :f_out].set(b)
        prepared.append((w_p.astype(jnp.bfloat16), b_p))
        k_in = f_out_pad
    return prepared


def reference_forward_f32(x, params):
    """Original module semantics (pure f32)."""
    B = x.shape[0]
    h = x.reshape(B, -1).astype(jnp.float32)
    n = len(params)
    for i, (w, b) in enumerate(params):
        h = h @ w + b
        if i < n - 1:
            h = jnp.tanh(h)
    return h


def reference_forward_bf16(x, params):
    """Mirrors the kernel's arithmetic (bf16 dot operands, f32 accumulate/bias/tanh)."""
    B = x.shape[0]
    h = x.reshape(B, -1).astype(jnp.float32)
    n = len(params)
    for i, (w, b) in enumerate(params):
        h = jnp.dot(h.astype(jnp.bfloat16), w.astype(jnp.bfloat16),
                    preferred_element_type=jnp.float32) + b
        if i < n - 1:
            h = jnp.tanh(h)
    return h


if __name__ == "__main__":
    key = jax.random.PRNGKey(0)
    kx, kp = jax.random.split(key)

    # Module config: n_layers=2, hidden_units=[32, 32], d_output=8,
    # activation=Tanh, use_batchnorm=False, dropout_rate=0.0 (both identities here).
    B, C, S = 8, 4, 16            # input (8, 4, 16) -> flattened d_input = 64
    d_input = C * S
    hidden_units = [32, 32]
    n_layers = 2
    d_output = 8

    x = jax.random.normal(kx, (B, C, S), jnp.float32)
    params = init_params(kp, n_layers, d_input, hidden_units, d_output)

    # One-time preparation (padding to 128-lane multiples + bf16 weight cast).
    prepared = prepare_params(params, d_input)

    out = jax.block_until_ready(
        stacked_vector_forward(x, prepared, d_output=d_output))

    assert out.shape == (B, d_output), out.shape

    # Tight check vs. a reference that mirrors the kernel's bf16-operand arithmetic.
    ref_bf16 = reference_forward_bf16(x, params)
    assert jnp.allclose(out, ref_bf16, atol=1e-3, rtol=1e-3), \
        float(jnp.max(jnp.abs(out - ref_bf16)))

    # Loose check vs. the original pure-f32 module semantics (bf16 operand rounding).
    ref_f32 = reference_forward_f32(x, params)
    assert jnp.allclose(out, ref_f32, atol=5e-2, rtol=5e-2), \
        float(jnp.max(jnp.abs(out - ref_f32)))

    print("KERNEL_OK")
</pallas_src>

<mosaic_0001>
module attributes {stable_mosaic.version = 11 : i64} {
  func.func @kernel(%arg0: memref<8x64xf32, #tpu.memory_space<vmem>>, %arg1: memref<64x128xbf16, #tpu.memory_space<vmem>>, %arg2: memref<1x128xf32, #tpu.memory_space<vmem>>, %arg3: memref<128x128xbf16, #tpu.memory_space<vmem>>, %arg4: memref<1x128xf32, #tpu.memory_space<vmem>>, %arg5: memref<128x128xbf16, #tpu.memory_space<vmem>>, %arg6: memref<1x128xf32, #tpu.memory_space<vmem>>, %arg7: memref<8x128xf32, #tpu.memory_space<vmem>>) attributes {dimension_semantics = [], scalar_prefetch = 0 : i64, scratch_operands = 0 : i64, tpu.core_type = #tpu.core_type<tc>} {
    %c0 = arith.constant 0 : index
    %c0_0 = arith.constant 0 : index
    %0 = vector.load %arg0[%c0, %c0_0] : memref<8x64xf32, #tpu.memory_space<vmem>>, vector<8x64xf32>
    %c0_1 = arith.constant 0 : index
    %c0_2 = arith.constant 0 : index
    %1 = vector.load %arg1[%c0_1, %c0_2] : memref<64x128xbf16, #tpu.memory_space<vmem>>, vector<64x128xbf16>
    %c0_3 = arith.constant 0 : index
    %c0_4 = arith.constant 0 : index
    %2 = vector.load %arg2[%c0_3, %c0_4] : memref<1x128xf32, #tpu.memory_space<vmem>>, vector<1x128xf32>
    %3 = arith.truncf %0 : vector<8x64xf32> to vector<8x64xbf16>
    %cst = arith.constant dense<0.000000e+00> : vector<8x128xf32>
    %4 = tpu.matmul %3, %1, %cst {dimension_numbers = #tpu.dot_dimension_numbers<[1], [0], [0], [1], [0, 0, 1, 1], [], []>} : vector<8x64xbf16>, vector<64x128xbf16>, vector<8x128xf32> -> vector<8x128xf32>
    %5 = vector.broadcast %2 : vector<1x128xf32> to vector<8x128xf32>
    %6 = arith.addf %4, %5 : vector<8x128xf32>
    %7 = math.tanh %6 : vector<8x128xf32>
    %c0_5 = arith.constant 0 : index
    %c0_6 = arith.constant 0 : index
    %8 = vector.load %arg3[%c0_5, %c0_6] : memref<128x128xbf16, #tpu.memory_space<vmem>>, vector<128x128xbf16>
    %c0_7 = arith.constant 0 : index
    %c0_8 = arith.constant 0 : index
    %9 = vector.load %arg4[%c0_7, %c0_8] : memref<1x128xf32, #tpu.memory_space<vmem>>, vector<1x128xf32>
    %10 = arith.truncf %7 : vector<8x128xf32> to vector<8x128xbf16>
    %cst_9 = arith.constant dense<0.000000e+00> : vector<8x128xf32>
    %11 = tpu.matmul %10, %8, %cst_9 {dimension_numbers = #tpu.dot_dimension_numbers<[1], [0], [0], [1], [0, 0, 1, 1], [], []>} : vector<8x128xbf16>, vector<128x128xbf16>, vector<8x128xf32> -> vector<8x128xf32>
    %12 = vector.broadcast %9 : vector<1x128xf32> to vector<8x128xf32>
    %13 = arith.addf %11, %12 : vector<8x128xf32>
    %14 = math.tanh %13 : vector<8x128xf32>
    %c0_10 = arith.constant 0 : index
    %c0_11 = arith.constant 0 : index
    %15 = vector.load %arg5[%c0_10, %c0_11] : memref<128x128xbf16, #tpu.memory_space<vmem>>, vector<128x128xbf16>
    %c0_12 = arith.constant 0 : index
    %c0_13 = arith.constant 0 : index
    %16 = vector.load %arg6[%c0_12, %c0_13] : memref<1x128xf32, #tpu.memory_space<vmem>>, vector<1x128xf32>
    %17 = arith.truncf %14 : vector<8x128xf32> to vector<8x128xbf16>
    %cst_14 = arith.constant dense<0.000000e+00> : vector<8x128xf32>
    %18 = tpu.matmul %17, %15, %cst_14 {dimension_numbers = #tpu.dot_dimension_numbers<[1], [0], [0], [1], [0, 0, 1, 1], [], []>} : vector<8x128xbf16>, vector<128x128xbf16>, vector<8x128xf32> -> vector<8x128xf32>
    %19 = vector.broadcast %16 : vector<1x128xf32> to vector<8x128xf32>
    %20 = arith.addf %18, %19 : vector<8x128xf32>
    %c0_15 = arith.constant 0 : index
    %c0_16 = arith.constant 0 : index
    %21 = vector.load %arg7[%c0_15, %c0_16] : memref<8x128xf32, #tpu.memory_space<vmem>>, vector<8x128xf32>
    tpu.vector_store %arg7[%c0_15, %c0_16], %20 {strides = array<i32>} : memref<8x128xf32, #tpu.memory_space<vmem>>, vector<8x128xf32>,
    return
  }
}

</mosaic_0001>

<bundles_post_ra>
// kernel: stacked_vector_forward.1
= control target key start
LH: loop header
LB: loop body
LE: loop exit
PB: predicated region body
PF: predicated region fallthrough
CT: control target
= control target key end

     0   :  { %12 = vsyncpa [#allocation3], 0  ;;  %s687_s0 = inlined_call_operand.vmem [shape: f32[8,64], index: 0, kind: input, shape index: {}]   ;;  %s688_s1 = inlined_call_operand.vmem [shape: bf16[64,128], index: 1, kind: input, shape index: {}]   ;;  %s689_s2 = inlined_call_operand.vmem [shape: f32[1,128], index: 2, kind: input, shape index: {}]   ;;  %s690_s3 = inlined_call_operand.hbm [shape: bf16[128,128], index: 3, kind: input, shape index: {}]   ;;  %s691_s4 = inlined_call_operand.vmem [shape: f32[1,128], index: 4, kind: input, shape index: {}]   ;;  %s692_s5 = inlined_call_operand.hbm [shape: bf16[128,128], index: 5, kind: input, shape index: {}]   ;;  %s693_s6 = inlined_call_operand.vmem [shape: f32[1,128], index: 6, kind: input, shape index: {}]   ;;  %s694_s7 = inlined_call_operand.hbm [shape: f32[8,128], index: 7, kind: output, shape index: {}]  }
   0x1   :  { %13 = vsyncpa [#allocation6], 0 }
   0x2   :  { %14 = vsyncpa [#allocation4], 0  ;;  %s580_s24 = smov [#allocation2]  }
   0x3   :  { %s26_s25 = sshll.u32 %s580_s24, 4  ;;  %s27_s25 = int_to_ptr.vmem [resolvable:$true] %s26_s25 }
   0x4   :  { %s522_s26 = scalar_lea.vmem %s27_s25, 1024  ;;  %p527_p1 = scmp.lt.s32.totalorder %s27_s25, %s27_s25 }
   0x5   :  { %p523_p0 = scmp.ne.s32.totalorder %s27_s25, %s522_s26  ;;  %p528_p2 = scmp.lt.s32.totalorder %s522_s26, %s522_s26 }
   0x7   :  { %p529_p3 = por %p528_p2, %p527_p1 }
   0x9   :  { %p530_p4 = pnand %p529_p3, %p523_p0 }
   0xb   :  { %533 = shalt.err (!%p530_p4)
}
   0xc   :  { %s581_s27 = smov 64   ;;  %s582_s28 = smov 4  }
   0xd   :  { %32 = dma.hbm_to_vmem [thread:$0]  %s690_s3, 1024, %s27_s25, [#allocation3], %s581_s27, %s581_s27, %s582_s28  }
   0xe   :  { %s583_s8 = smov [#allocation5]  }
   0xf   :  { %s40_s9 = sshll.u32 %s583_s8, 4  ;;  %s41_s9 = int_to_ptr.vmem [resolvable:$true] %s40_s9 }
  0x10   :  { %s542_s10 = scalar_lea.vmem %s41_s9, 1024  ;;  %p547_p6 = scmp.lt.s32.totalorder %s41_s9, %s41_s9 }
  0x11   :  { %p543_p5 = scmp.ne.s32.totalorder %s41_s9, %s542_s10  ;;  %p548_p7 = scmp.lt.s32.totalorder %s542_s10, %s542_s10 }
  0x13   :  { %p549_p8 = por %p548_p7, %p547_p6 }
  0x15   :  { %p550_p9 = pnand %p549_p8, %p543_p5 }
  0x17   :  { %553 = shalt.err (!%p550_p9)
}
  0x18   :  { %46 = dma.hbm_to_vmem [thread:$0]  %s692_s5, 1024, %s41_s9, [#allocation6], %s581_s27, %s581_s27, %s582_s28  }
  0x19   :  { %574 = dma.done.wait [#allocation3], 1024  }
  0x1a   :  { %575 = vsyncadd [#allocation3], 4294966272 }
  0x1b   :  { %576 = dma.done.wait [#allocation6], 1024  }
  0x1c   :  { %577 = vsyncadd [#allocation6], 4294966272  ;;  %v584_v0 = vmov 0.0   ;;  %vm585_vm0 = vmmov 0   ;;  %v490_v1 = vld [vmem:[%s688_s1 + $0x18] sm:$0xff]   ;;  %v491_v2 = vld [vmem:[%s688_s1 + $0x10] sm:$0xff]  }
  0x1d   :  { %431 = vmatprep.subr.bf16.mxu0 %v584_v0  ;;  %439 = vmatprep.mubr.msk.bf16.mxu0 %vm585_vm0, %v584_v0  ;;  %v494_v3 = vld [vmem:[#allocation2 + $0x38] sm:$0xff]   ;;  %v492_v4 = vld [vmem:[%s688_s1 + $0x8] sm:$0xff]   ;;  %vm97_vm1 = vcmask 523264   ;;  %v495_v5 = vld [vmem:[#allocation2 + $0x30] sm:$0xff]   ;;  %s586_s24 = smov [#allocation7]  }
  0x1e   :  { %443 = vmatprep.subr.bf16.mxu1 %v584_v0  ;;  %459 = vmatprep.mubr.msk.bf16.mxu1 %vm585_vm0, %v584_v0  ;;  %v493_v6 = vld [vmem:[%s688_s1] sm:$0xff]   ;;  %v496_v8 = vld [vmem:[#allocation2 + $0x28] sm:$0xff]   ;;  %v498_v11 = vld [vmem:[#allocation2 + $0x18] sm:$0xff]   ;;  %s374_s25 = sshll.u32 %s586_s24, 4  ;;  %s375_s25 = int_to_ptr.vmem [resolvable:$true] %s374_s25 }
  0x1f   :  { %432 = vmatpush3.bf16.msra.mxu0 %v490_v1  ;;  %444 = vmatpush3.bf16.msra.mxu1 %v494_v3  ;;  %v56_v7 = vld [vmem:[%s687_s0] sm:$0xff]  ;;  %v499_v12 = vld [vmem:[#allocation2 + $0x10] sm:$0xff]   ;;  %v500_v13 = vld [vmem:[#allocation2 + $0x8] sm:$0xff]   ;;  %p559_p11 = scmp.lt.s32.totalorder %s375_s25, %s375_s25 }
  0x20   :  { %433 = vmatprep.subr.bf16.mxu0 %v584_v0  ;;  %445 = vmatprep.subr.bf16.mxu1 %v584_v0  ;;  %v66_v9 = vpack.c.bf16 %v56_v7, %v56_v7  ;;  %v497_v10 = vld [vmem:[#allocation2 + $0x20] sm:$0xff]   ;;  %v502_v15 = vld [vmem:[#allocation5 + $0x38] sm:$0xff]   ;;  %v503_v16 = vld [vmem:[#allocation5 + $0x30] sm:$0xff]  }
  0x21   :  { %v501_v14 = vld [vmem:[#allocation2] sm:$0xff]   ;;  %v504_v17 = vld [vmem:[#allocation5 + $0x28] sm:$0xff]   ;;  %v506_v27 = vld [vmem:[#allocation5 + $0x18] sm:$0xff]  }
  0x22   :  { %v384_v18 = vld [vmem:[%s689_s2] ss:$0 sm:$0xff]  ;;  %v507_v28 = vld [vmem:[#allocation5 + $0x10] sm:$0xff]   ;;  %v508_v29 = vld [vmem:[#allocation5 + $0x8] sm:$0xff]  }
  0x23   :  { %434 = vmatpush3.bf16.msra.mxu0 %v491_v2  ;;  %446 = vmatpush3.bf16.msra.mxu1 %v495_v5  ;;  %v505_v26 = vld [vmem:[#allocation5 + $0x20] sm:$0xff]  }
  0x24   :  { %435 = vmatprep.subr.bf16.mxu0 %v584_v0  ;;  %447 = vmatprep.subr.bf16.mxu1 %v584_v0  ;;  %v509_v30 = vld [vmem:[#allocation5] sm:$0xff]  }
  0x25   :  { %v390_v31 = vld [vmem:[%s691_s4] ss:$0 sm:$0xff]  ;;  %s554_s4 = scalar_lea.vmem %s375_s25, 128 }
  0x26   :  { %v399_v39 = vld [vmem:[%s693_s6] ss:$0 sm:$0xff]  ;;  %p555_p10 = scmp.ne.s32.totalorder %s375_s25, %s554_s4  ;;  %p560_p12 = scmp.lt.s32.totalorder %s554_s4, %s554_s4 }
  0x27   :  { %436 = vmatpush3.bf16.msra.mxu0 %v492_v4  ;;  %448 = vmatpush3.bf16.msra.mxu1 %v496_v8 }
  0x28   :  { %437 = vmatprep.subr.bf16.mxu0 %v584_v0  ;;  %449 = vmatprep.subr.bf16.mxu1 %v584_v0  ;;  %p561_p13 = por %p560_p12, %p559_p11 }
  0x2a   :  { %p562_p0 = pnand %p561_p13, %p555_p10 }
  0x2b   :  { %438 = vmatpush3.bf16.msra.mxu0 %v493_v6  ;;  %450 = vmatpush3.bf16.msra.mxu1 %v497_v10 }
  0x2c   :  { %463 = vmatprep.subr.bf16.mxu0 %v584_v0  ;;  %451 = vmatprep.subr.bf16.mxu1 %v584_v0 }
  0x2e   :  { %440 = vmatmul.mubr.msk.bf16.vlgmr.msra.gmra.mxu0 %vm97_vm1, %v66_v9 }
  0x2f   :  { %479 = vmatprep.mubr.msk.bf16.mxu0 %vm585_vm0, %v584_v0  ;;  %452 = vmatpush3.bf16.msra.mxu1 %v498_v11 }
  0x30   :  { %453 = vmatprep.subr.bf16.mxu1 %v584_v0  ;;  %464 = vmatpush3.bf16.msra.mxu0 %v502_v15 }
  0x31   :  { %465 = vmatprep.subr.bf16.mxu0 %v584_v0 }
  0x33   :  { %454 = vmatpush3.bf16.msra.mxu1 %v499_v12 }
  0x34   :  { %455 = vmatprep.subr.bf16.mxu1 %v584_v0  ;;  %466 = vmatpush3.bf16.msra.mxu0 %v503_v16 }
  0x35   :  { %467 = vmatprep.subr.bf16.mxu0 %v584_v0 }
  0x37   :  { %456 = vmatpush3.bf16.msra.mxu1 %v500_v13 }
  0x38   :  { %457 = vmatprep.subr.bf16.mxu1 %v584_v0  ;;  %468 = vmatpush3.bf16.msra.mxu0 %v504_v17 }
  0x39   :  { %469 = vmatprep.subr.bf16.mxu0 %v584_v0 }
  0x3b   :  { %458 = vmatpush3.bf16.msra.mxu1 %v501_v14 }
  0x3c   :  { %470 = vmatpush3.bf16.msra.mxu0 %v505_v26 }
  0x3d   :  { %471 = vmatprep.subr.bf16.mxu0 %v584_v0 }
  0x40   :  { %472 = vmatpush3.bf16.msra.mxu0 %v506_v27 }
  0x41   :  { %473 = vmatprep.subr.bf16.mxu0 %v584_v0 }
  0x44   :  { %474 = vmatpush3.bf16.msra.mxu0 %v507_v28 }
  0x45   :  { %475 = vmatprep.subr.bf16.mxu0 %v584_v0 }
  0x48   :  { %476 = vmatpush3.bf16.msra.mxu0 %v508_v29 }
  0x49   :  { %477 = vmatprep.subr.bf16.mxu0 %v584_v0 }
  0x4c   :  { %478 = vmatpush3.bf16.msra.mxu0 %v509_v30 }
  0xee   :  { %v135_v19 = vpop.f32.mrf.mxu0 }
  0xef   :  { %v136_v20 = vadd.f32 %v384_v18, %v135_v19 }
  0xf0   :  { %v441_v21 = vpop.f32.mrf.mxu0 }
  0xf1   :  { %510 = vtanh.f32 %v136_v20 }
  0xf2   :  { %v138_v22 = vpop.f32.mrf.mxu0 }
  0xf4   :  { %v442_v23 = vpop.f32.mrf.mxu0 }
  0xfe   :  { %v511_v24 = vpop.eup %510 }
  0xff   :  { %v159_v25 = vpack.c.bf16 %v511_v24, %v511_v24 }
 0x101   :  { %460 = vmatmul.mubr.bf16.vlgmr.msra.gmra.mxu1 %v159_v25 }
 0x1c1   :  { %v248_v32 = vpop.f32.mrf.mxu1 }
 0x1c2   :  { %v249_v33 = vadd.f32 %v390_v31, %v248_v32 }
 0x1c3   :  { %v461_v34 = vpop.f32.mrf.mxu1 }
 0x1c4   :  { %512 = vtanh.f32 %v249_v33 }
 0x1c5   :  { %v251_v35 = vpop.f32.mrf.mxu1 }
 0x1c7   :  { %v462_v36 = vpop.f32.mrf.mxu1 }
 0x1d1   :  { %v513_v37 = vpop.eup %512 }
 0x1d2   :  { %v272_v38 = vpack.c.bf16 %v513_v37, %v513_v37 }
 0x1d4   :  { %480 = vmatmul.mubr.bf16.vlgmr.msra.gmra.mxu0 %v272_v38 }
 0x294   :  { %v361_v40 = vpop.f32.mrf.mxu0 }
 0x295   :  { %v362_v41 = vadd.f32 %v399_v39, %v361_v40 }
 0x296   :  { %v481_v42 = vpop.f32.mrf.mxu0 }
 0x297   :  { %367 = vst [vmem:[#allocation7] sm:$0xff] %v362_v41 }
 0x298   :  { %v364_v43 = vpop.f32.mrf.mxu0 }
 0x299   :  { %565 = shalt.err (!%p562_p0)
}
 0x29a   :  { %377 = dma.vmem_to_hbm [thread:$0]  %s375_s25, 128, %s694_s7, [#allocation4]   ;;  %v482_v44 = vpop.f32.mrf.mxu0 }
 0x29b   :  { %578 = dma.done.wait [#allocation4], 128  }
 0x29c   :  { %579 = vsyncadd [#allocation4], 4294967168 }
 0x29d   :  { %381 = vsyncpa [#allocation3], 1 }
 0x29e   :  { %382 = vsyncpa [#allocation6], 1 }
 0x29f   :  { %383 = vsyncpa [#allocation4], 1 }

</bundles_post_ra>
